<compile_context>
chip_gen: v7x
topology: tpu7x:2x2x1
jax: 0.10.0
libtpu: 0.0.40
codegen_flags: <defaults>
</compile_context>

<pallas_src>
from typing import NamedTuple

import jax
import jax.numpy as jnp
from jax import lax
from jax.experimental import pallas as pl
from jax.experimental.pallas import tpu as pltpu


def _round_up(x, m):
    return ((x + m - 1) // m) * m


def _linear_sigmoid_kernel(x_ref, w_ref, b_ref, o_ref):
    # x_ref: (TB, Fp) f32    w_ref: (Fp, TC) bf16    b_ref: (1, TC) f32
    # o_ref: (TB, TC) f32
    x_bf = x_ref[...].astype(jnp.bfloat16)           # per-tile cast in VMEM
    logits = lax.dot_general(                         # (TB, Fp) @ (Fp, TC)
        x_bf, w_ref[...],
        dimension_numbers=(((1,), (0,)), ((), ())),
        preferred_element_type=jnp.float32,           # f32 MXU accumulation
    )
    logits = logits + b_ref[...]                      # (1, TC) broadcast, f32
    # sigmoid(z) == 0.5 * (tanh(0.5 * z) + 1): tanh -> EUP, stays f32.
    o_ref[...] = (0.5 * (jnp.tanh(0.5 * logits) + 1.0)).astype(o_ref.dtype)


class PreparedParams(NamedTuple):
    w_t: jax.Array        # (Fp, Cp) bf16, pre-transposed + zero-padded
    b2d: jax.Array        # (1, Cp) f32, zero-padded
    num_classes: int      # original C
    feat_dim: int         # original F = prod(input_dim)
    class_tile: int       # TC (multiple of 128, divides Cp)


def prepare_params(weight, bias, *, class_tile=512):
    """One-time parameter prep (cast / pad / transpose).  Not per-call."""
    C, F = weight.shape
    TC = _round_up(min(class_tile, _round_up(max(C, 128), 128)), 128)
    Cp = _round_up(max(C, TC), TC)
    Fp = _round_up(F, 128)

    w = weight
    if (Cp, Fp) != (C, F):
        w = jnp.pad(w, ((0, Cp - C), (0, Fp - F)))
    w_t = jnp.transpose(w).astype(jnp.bfloat16)       # (Fp, Cp), lane-dense Cp

    b = bias if Cp == C else jnp.pad(bias, (0, Cp - C))
    b2d = b.reshape(1, Cp).astype(jnp.float32)
    return PreparedParams(w_t, b2d, C, F, TC)


def multiclass_hamming_classifier(x, params: PreparedParams, *, batch_tile=256):
    """Forward pass: sigmoid(x.reshape(B, -1) @ W.T + b) -> (B, C) f32."""
    w_t, b2d, C, F, TC = params
    Fp, Cp = w_t.shape
    B = x.shape[0]

    x2d = x.reshape(B, -1)                            # flatten, stays f32
    assert x2d.shape[1] == F, "input feature dim mismatch"
    if Fp != F:
        x2d = jnp.pad(x2d, ((0, 0), (0, Fp - F)))     # 128-align lane axis

    TB = _round_up(min(batch_tile, _round_up(B, 16)), 16)
    Bp = _round_up(B, TB)
    if Bp != B:
        x2d = jnp.pad(x2d, ((0, Bp - B), (0, 0)))
    n_b = Bp // TB
    n_c = Cp // TC

    # Scoped-VMEM limit sized from the actual (double-buffered) tiles,
    # with 2x headroom, clamped to [16 MiB, 128 MiB].
    buf_bytes = (2 * TB * Fp * 4          # x tiles, f32
                 + 2 * Fp * TC * 2        # weight tiles, bf16
                 + 2 * 8 * TC * 4         # bias tile (sublane-padded), f32
                 + 2 * TB * TC * 4)       # out tiles, f32
    vmem_limit = int(min(128 * 1024 * 1024,
                         max(16 * 1024 * 1024, 2 * buf_bytes)))

    cost = pl.CostEstimate(
        flops=2 * Bp * Fp * Cp,
        transcendentals=Bp * Cp,
        bytes_accessed=(n_c * Bp * Fp * 4 + Fp * Cp * 2 + Cp * 4
                        + Bp * Cp * 4),
    )

    out = pl.pallas_call(
        _linear_sigmoid_kernel,
        out_shape=jax.ShapeDtypeStruct((Bp, Cp), jnp.float32),
        grid=(n_c, n_b),                               # class outer, batch inner
        in_specs=[
            pl.BlockSpec((TB, Fp), lambda c, b: (b, 0)),   # x: streamed over B
            pl.BlockSpec((Fp, TC), lambda c, b: (0, c)),   # W: reused over B
            pl.BlockSpec((1, TC), lambda c, b: (0, c)),    # bias
        ],
        out_specs=pl.BlockSpec((TB, TC), lambda c, b: (b, c)),
        compiler_params=pltpu.CompilerParams(
            dimension_semantics=("parallel", "parallel"),
            vmem_limit_bytes=vmem_limit,
        ),
        cost_estimate=cost,
    )(x2d, w_t, b2d)

    return out[:B, :C]


if __name__ == "__main__":
    # Small shapes implied by the module: input_dim = (d0, d1), num_classes=C.
    B, d0, d1, C = 2, 8, 32, 10
    F = d0 * d1

    key = jax.random.PRNGKey(0)
    kx, kw, kb = jax.random.split(key, 3)

    x = jax.random.normal(kx, (B, d0, d1), dtype=jnp.float32)

    # Deterministic nn.Linear-style init: U(-1/sqrt(F), 1/sqrt(F)).
    bound = 1.0 / (F ** 0.5)
    weight = jax.random.uniform(kw, (C, F), minval=-bound, maxval=bound,
                                dtype=jnp.float32)
    bias = jax.random.uniform(kb, (C,), minval=-bound, maxval=bound,
                              dtype=jnp.float32)

    # One-time parameter prep (cast + pad + transpose), outside the hot path.
    params = prepare_params(weight, bias)

    out = multiclass_hamming_classifier(x, params)
    out = jax.block_until_ready(out)
    assert out.shape == (B, C)

    # Reference with the same bf16 operand quantization (tight tolerance).
    x_bf = x.reshape(B, F).astype(jnp.bfloat16).astype(jnp.float32)
    w_bf = weight.astype(jnp.bfloat16).astype(jnp.float32)
    ref_bf16 = jax.nn.sigmoid(x_bf @ w_bf.T + bias)
    assert jnp.allclose(out, ref_bf16, atol=1e-4, rtol=1e-4)

    # Full-f32 reference (loose tolerance: bounded by bf16 quantization).
    ref_f32 = jax.nn.sigmoid(x.reshape(B, F) @ weight.T + bias)
    assert jnp.allclose(out, ref_f32, atol=2e-2, rtol=2e-2)

    print("KERNEL_OK")
</pallas_src>

<mosaic_0001>
module attributes {stable_mosaic.version = 11 : i64} {
  func.func @_linear_sigmoid_kernel(%arg0: i32, %arg1: i32, %arg2: memref<16x256xf32, #tpu.memory_space<vmem>>, %arg3: memref<256x128xbf16, #tpu.memory_space<vmem>>, %arg4: memref<1x128xf32, #tpu.memory_space<vmem>>, %arg5: memref<16x128xf32, #tpu.memory_space<vmem>>) attributes {dimension_semantics = [#tpu.dimension_semantics<parallel>, #tpu.dimension_semantics<parallel>], iteration_bounds = array<i64: 1, 1>, scalar_prefetch = 0 : i64, scratch_operands = 0 : i64, tpu.core_type = #tpu.core_type<tc>, window_params = [{transform_indices = @transform_0, window_bounds = array<i64: 16, 256>}, {transform_indices = @transform_1, window_bounds = array<i64: 256, 128>}, {transform_indices = @transform_2, window_bounds = array<i64: 1, 128>}, {transform_indices = @transform_3, window_bounds = array<i64: 16, 128>}]} {
    %c0 = arith.constant 0 : index
    %c0_0 = arith.constant 0 : index
    %0 = vector.load %arg2[%c0, %c0_0] : memref<16x256xf32, #tpu.memory_space<vmem>>, vector<16x256xf32>
    %1 = arith.truncf %0 : vector<16x256xf32> to vector<16x256xbf16>
    %c0_1 = arith.constant 0 : index
    %c0_2 = arith.constant 0 : index
    %2 = vector.load %arg3[%c0_1, %c0_2] : memref<256x128xbf16, #tpu.memory_space<vmem>>, vector<256x128xbf16>
    %cst = arith.constant dense<0.000000e+00> : vector<16x128xf32>
    %3 = tpu.matmul %1, %2, %cst {dimension_numbers = #tpu.dot_dimension_numbers<[1], [0], [0], [1], [0, 0, 1, 1], [], []>} : vector<16x256xbf16>, vector<256x128xbf16>, vector<16x128xf32> -> vector<16x128xf32>
    %c0_3 = arith.constant 0 : index
    %c0_4 = arith.constant 0 : index
    %4 = vector.load %arg4[%c0_3, %c0_4] : memref<1x128xf32, #tpu.memory_space<vmem>>, vector<1x128xf32>
    %5 = vector.broadcast %4 : vector<1x128xf32> to vector<16x128xf32>
    %6 = arith.addf %3, %5 : vector<16x128xf32>
    %cst_5 = arith.constant 5.000000e-01 : f32
    %7 = vector.broadcast %cst_5 : f32 to vector<16x128xf32>
    %8 = arith.mulf %7, %6 : vector<16x128xf32>
    %9 = math.tanh %8 : vector<16x128xf32>
    %cst_6 = arith.constant 1.000000e+00 : f32
    %10 = vector.broadcast %cst_6 : f32 to vector<16x128xf32>
    %11 = arith.addf %9, %10 : vector<16x128xf32>
    %cst_7 = arith.constant 5.000000e-01 : f32
    %12 = vector.broadcast %cst_7 : f32 to vector<16x128xf32>
    %13 = arith.mulf %12, %11 : vector<16x128xf32>
    %c0_8 = arith.constant 0 : index
    %c0_9 = arith.constant 0 : index
    %14 = vector.load %arg5[%c0_8, %c0_9] : memref<16x128xf32, #tpu.memory_space<vmem>>, vector<16x128xf32>
    tpu.vector_store %arg5[%c0_8, %c0_9], %13 {strides = array<i32>} : memref<16x128xf32, #tpu.memory_space<vmem>>, vector<16x128xf32>,
    return
  }
  func.func @transform_0(%arg0: i32, %arg1: i32) -> (i32, i32) {
    %c0_i32 = arith.constant 0 : i32
    %c0_i32_0 = arith.constant 0 : i32
    return %arg1, %c0_i32 : i32, i32
  }
  func.func @transform_1(%arg0: i32, %arg1: i32) -> (i32, i32) {
    %c0_i32 = arith.constant 0 : i32
    %c0_i32_0 = arith.constant 0 : i32
    return %c0_i32, %arg0 : i32, i32
  }
  func.func @transform_2(%arg0: i32, %arg1: i32) -> (i32, i32) {
    %c0_i32 = arith.constant 0 : i32
    %c0_i32_0 = arith.constant 0 : i32
    return %c0_i32, %arg0 : i32, i32
  }
  func.func @transform_3(%arg0: i32, %arg1: i32) -> (i32, i32) {
    %c0_i32 = arith.constant 0 : i32
    return %arg1, %arg0 : i32, i32
  }
}

</mosaic_0001>

<bundles_post_ra>
// kernel: tpu_custom_call.1
= control target key start
LH: loop header
LB: loop body
LE: loop exit
PB: predicated region body
PF: predicated region fallthrough
CT: control target
= control target key end

     0   :  { %8 = vsyncpa [#allocation3], 0  ;;  %s462_s0 = inlined_call_operand.hbm [shape: f32[16,256], index: 0, kind: input, shape index: {}]   ;;  %s463_s1 = inlined_call_operand.hbm [shape: bf16[256,128], index: 1, kind: input, shape index: {}]   ;;  %s464_s2 = inlined_call_operand.vmem [shape: f32[1,128], index: 2, kind: input, shape index: {}]   ;;  %s465_s3 = inlined_call_operand.hbm [shape: f32[16,128], index: 3, kind: output, shape index: {}]  }
   0x1   :  { %9 = vsyncpa [#allocation6], 0 }
   0x2   :  { %10 = vsyncpa [#allocation4], 0  ;;  %s394_s12 = smov [#allocation2]   ;;  %s322_s16 = scalar_lea.hbm %s462_s0, 512 }
   0x3   :  { %s16_s13 = sshll.u32 %s394_s12, 4  ;;  %p323_p0 = scmp.ne.s32.totalorder %s462_s0, %s322_s16  ;;  %s17_s13 = int_to_ptr.vmem [resolvable:$true] %s16_s13 }
   0x4   :  { %p326_p1 = scmp.lt.u32.totalorder %s322_s16, %s462_s0 }
   0x6   :  { %p328_p2 = pnand %p326_p1, %p323_p0 }
   0x8   :  { %331 = shalt.err (!%p328_p2)
}
   0x9   :  { %s332_s21 = scalar_lea.vmem %s17_s13, 512  ;;  %p337_p4 = scmp.lt.s32.totalorder %s17_s13, %s17_s13 }
   0xa   :  { %p333_p3 = scmp.ne.s32.totalorder %s17_s13, %s332_s21  ;;  %p338_p5 = scmp.lt.s32.totalorder %s332_s21, %s332_s21 }
   0xc   :  { %p339_p6 = por %p338_p5, %p337_p4 }
   0xe   :  { %p340_p7 = pnand %p339_p6, %p333_p3 }
  0x10   :  { %343 = shalt.err (!%p340_p7)
}
  0x11   :  { %s395_s22 = smov 256   ;;  %s396_s23 = smov 16  }
  0x12   :  { %22 = dma.hbm_to_vmem [thread:$0]  %s462_s0, 512, %s17_s13, [#allocation3], %s395_s22, %s395_s22, %s396_s23  }
  0x13   :  { %s397_s26 = smov [#allocation5]   ;;  %s344_s30 = scalar_lea.hbm %s463_s1, 2048 }
  0x14   :  { %s28_s27 = sshll.u32 %s397_s26, 4  ;;  %p345_p8 = scmp.ne.s32.totalorder %s463_s1, %s344_s30  ;;  %s29_s27 = int_to_ptr.vmem [resolvable:$true] %s28_s27 }
  0x15   :  { %p348_p9 = scmp.lt.u32.totalorder %s344_s30, %s463_s1 }
  0x17   :  { %p350_p10 = pnand %p348_p9, %p345_p8 }
  0x19   :  { %353 = shalt.err (!%p350_p10)
}
  0x1a   :  { %s354_s8 = scalar_lea.vmem %s29_s27, 2048  ;;  %p359_p12 = scmp.lt.s32.totalorder %s29_s27, %s29_s27 }
  0x1b   :  { %p355_p11 = scmp.ne.s32.totalorder %s29_s27, %s354_s8  ;;  %p360_p13 = scmp.lt.s32.totalorder %s354_s8, %s354_s8 }
  0x1d   :  { %p361_p0 = por %p360_p13, %p359_p12 }
  0x1f   :  { %p362_p1 = pnand %p361_p0, %p355_p11 }
  0x21   :  { %365 = shalt.err (!%p362_p1)
}
  0x22   :  { %s398_s0 = smov 64   ;;  %s399_s9 = smov 4  }
  0x23   :  { %34 = dma.hbm_to_vmem [thread:$0]  %s463_s1, 2048, %s29_s27, [#allocation6], %s398_s0, %s398_s0, %s399_s9  }
  0x24   :  { %388 = dma.done.wait [#allocation3], 512  }
  0x25   :  { %389 = vsyncadd [#allocation3], 4294966784 }
  0x26   :  { %390 = dma.done.wait [#allocation6], 2048  }
  0x27   :  { %391 = vsyncadd [#allocation6], 4294965248  ;;  %v302_v0 = vld [vmem:[#allocation5 + $0x40] sm:$0xff]   ;;  %v304_v2 = vld [vmem:[#allocation5 + $0x48] sm:$0xff]   ;;  %s400_s13 = smov [#allocation7]  }
  0x28   :  { %v303_v1 = vld [vmem:[#allocation5] sm:$0xff]   ;;  %271 = vmatprep.subr.bf16.mxu0 %v302_v0  ;;  %v305_v3 = vld [vmem:[#allocation5 + $0x8] sm:$0xff]   ;;  %v306_v4 = vld [vmem:[#allocation5 + $0x50] sm:$0xff]   ;;  %s241_s14 = sshll.u32 %s400_s13, 4  ;;  %s242_s14 = int_to_ptr.vmem [resolvable:$true] %s241_s14 }
  0x29   :  { %272 = vmatpush3.bf16.msra.mxu0 %v303_v1  ;;  %v307_v5 = vld [vmem:[#allocation5 + $0x10] sm:$0xff]   ;;  %v308_v6 = vld [vmem:[#allocation5 + $0x58] sm:$0xff]   ;;  %v310_v8 = vld [vmem:[#allocation5 + $0x60] sm:$0xff]   ;;  %p371_p3 = scmp.lt.s32.totalorder %s242_s14, %s242_s14 }
  0x2a   :  { %273 = vmatprep.subr.bf16.mxu0 %v304_v2  ;;  %v309_v7 = vld [vmem:[#allocation5 + $0x18] sm:$0xff]   ;;  %v311_v9 = vld [vmem:[#allocation5 + $0x20] sm:$0xff]   ;;  %v312_v10 = vld [vmem:[#allocation5 + $0x68] sm:$0xff]  }
  0x2b   :  { %v45_v11 = vld [vmem:[#allocation2 + $0x8] sm:$0xff]  ;;  %v47_v12 = vld [vmem:[#allocation2 + $0x18] sm:$0xff]  ;;  %v314_v15 = vld [vmem:[#allocation5 + $0x70] sm:$0xff]  }
  0x2c   :  { %v49_v13 = vpack.c.bf16 %v47_v12, %v45_v11  ;;  %v313_v14 = vld [vmem:[#allocation5 + $0x28] sm:$0xff]   ;;  %v315_v16 = vld [vmem:[#allocation5 + $0x30] sm:$0xff]   ;;  %v316_v17 = vld [vmem:[#allocation5 + $0x78] sm:$0xff]  }
  0x2d   :  { %274 = vmatpush3.bf16.msra.mxu0 %v305_v3  ;;  %v317_v18 = vld [vmem:[#allocation5 + $0x38] sm:$0xff]   ;;  %v44_v19 = vld [vmem:[#allocation2] sm:$0xff]  ;;  %v46_v20 = vld [vmem:[#allocation2 + $0x10] sm:$0xff] }
  0x2e   :  { %275 = vmatprep.subr.bf16.mxu0 %v306_v4  ;;  %217 = vmatprep.mubr.bf16.mxu0 %v49_v13  ;;  %v48_v21 = vpack.c.bf16 %v46_v20, %v44_v19  ;;  %v254_v23 = vld [vmem:[%s464_s2] ss:$0 sm:$0xff]  ;;  %s366_s2 = scalar_lea.vmem %s242_s14, 256 }
  0x2f   :  { %p367_p2 = scmp.ne.s32.totalorder %s242_s14, %s366_s2  ;;  %p372_p4 = scmp.lt.s32.totalorder %s366_s2, %s366_s2 }
  0x31   :  { %276 = vmatpush3.bf16.msra.mxu0 %v307_v5  ;;  %p373_p5 = por %p372_p4, %p371_p3 }
  0x32   :  { %277 = vmatprep.subr.bf16.mxu0 %v308_v6 }
  0x33   :  { %p374_p6 = pnand %p373_p5, %p367_p2 }
  0x35   :  { %278 = vmatpush3.bf16.msra.mxu0 %v309_v7 }
  0x36   :  { %279 = vmatprep.subr.bf16.mxu0 %v310_v8 }
  0x39   :  { %280 = vmatpush3.bf16.msra.mxu0 %v311_v9 }
  0x3a   :  { %281 = vmatprep.subr.bf16.mxu0 %v312_v10 }
  0x3d   :  { %282 = vmatpush3.bf16.msra.mxu0 %v313_v14 }
  0x3e   :  { %283 = vmatprep.subr.bf16.mxu0 %v314_v15 }
  0x41   :  { %284 = vmatpush3.bf16.msra.mxu0 %v315_v16 }
  0x42   :  { %285 = vmatprep.subr.bf16.mxu0 %v316_v17 }
  0x45   :  { %286 = vmatpush3.bf16.msra.mxu0 %v317_v18 }
  0x48   :  { %218 = vmatmul.mubr.bf16.vlgmr.msra.gmra.mrb[0].mxu0 %v48_v21 }
 0x11b   :  { %v287_v22 = vpop.f32.mrb[0].mxu0 }
 0x11c   :  { %v288_v24 = vpop.f32.mrb[1].mxu0 }
 0x11d   :  { %v289_v25 = vadd.f32 %v288_v24, %v287_v22  ;;  %v290_v26 = vpop.f32.mrb[2].mxu0 }
 0x11e   :  { %v291_v27 = vpop.f32.mrb[3].mxu0 }
 0x11f   :  { %v220_v28 = vadd.f32 %v289_v25, %v254_v23  ;;  %v292_v29 = vadd.f32 %v291_v27, %v290_v26 }
 0x121   :  { %v226_v30 = vmul.f32 0.5, %v220_v28  ;;  %v223_v31 = vadd.f32 %v292_v29, %v254_v23 }
 0x123   :  { %318 = vtanh.f32 %v226_v30  ;;  %v227_v32 = vmul.f32 0.5, %v223_v31 }
 0x125   :  { %320 = vtanh.f32 %v227_v32 }
 0x12d   :  { %v319_v33 = vpop.eup %318 }
 0x12e   :  { %v230_v34 = vadd.f32 1.0, %v319_v33 }
 0x12f   :  { %v321_v35 = vpop.eup %320 }
 0x130   :  { %v232_v36 = vmul.f32 0.5, %v230_v34  ;;  %v231_v37 = vadd.f32 1.0, %v321_v35 }
 0x132   :  { %234 = vst [vmem:[#allocation7] sm:$0xff] %v232_v36  ;;  %v233_v38 = vmul.f32 0.5, %v231_v37 }
 0x134   :  { %235 = vst [vmem:[#allocation7 + $0x8] sm:$0xff] %v233_v38 }
 0x135   :  { %377 = shalt.err (!%p374_p6)
}
 0x136   :  { %s378_s17 = scalar_lea.hbm %s465_s3, 256 }
 0x137   :  { %p379_p7 = scmp.ne.s32.totalorder %s465_s3, %s378_s17  ;;  %p382_p8 = scmp.lt.u32.totalorder %s378_s17, %s465_s3 }
 0x139   :  { %p384_p9 = pnand %p382_p8, %p379_p7 }
 0x13b   :  { %387 = shalt.err (!%p384_p9)
}
 0x13c   :  { %s401_s22 = smov 128   ;;  %s402_s23 = smov 8  }
 0x13d   :  { %247 = dma.vmem_to_hbm [thread:$0]  %s242_s14, 256, %s465_s3, [#allocation4], %s401_s22, %s401_s22, %s402_s23  }
 0x13e   :  { %392 = dma.done.wait [#allocation4], 256  }
 0x13f   :  { %393 = vsyncadd [#allocation4], 4294967040 }
 0x140   :  { %251 = vsyncpa [#allocation3], 1 }
 0x141   :  { %252 = vsyncpa [#allocation6], 1 }
 0x142   :  { %253 = vsyncpa [#allocation4], 1 }

</bundles_post_ra>
